<compile_context>
chip_gen: v7x
topology: tpu7x:2x2x1
jax: 0.10.0
libtpu: 0.0.40
codegen_flags: <defaults>
</compile_context>

<pallas_src>
import functools

import jax
import jax.numpy as jnp
from jax.experimental import pallas as pl
from jax.experimental.pallas import tpu as pltpu

EPS = 1e-5
LANE = 128


def _round_up(x, m):
    return ((x + m - 1) // m) * m


def _tpu_vmem_capacity_bytes():
    try:
        return int(pltpu.get_tpu_info().vmem_capacity_bytes)
    except Exception:
        return 64 * (1 << 20)          # conservative (v7x per-TensorCore VMEM)


# ---------------------------------------------------------------------------
# Pass 1 (stats only): relu -> matmul(s) -> per-channel sum / sum-of-squares.
# Nothing M-sized is written back to HBM.
# ---------------------------------------------------------------------------
def _fr_stats_fused_kernel(xp_ref, wbd_ref, s_ref, q_ref):
    @pl.when(pl.program_id(1) == 0)
    def _init():
        s_ref[...] = jnp.zeros_like(s_ref)
        q_ref[...] = jnp.zeros_like(q_ref)

    a = jnp.maximum(xp_ref[...], 0)          # relu commutes with the subsample
    # Single block-diagonal matmul: [a1 | a2] @ [[w1,0],[0,w2]] == [y1 | y2]
    y = jnp.dot(a, wbd_ref[...], preferred_element_type=jnp.float32)
    s_ref[...] += jnp.sum(y, axis=0, keepdims=True)
    q_ref[...] += jnp.sum(y * y, axis=0, keepdims=True)


def _fr_stats_split_kernel(x1_ref, x2_ref, w1_ref, w2_ref, s_ref, q_ref,
                           *, c_half_p):
    @pl.when(pl.program_id(1) == 0)
    def _init():
        s_ref[...] = jnp.zeros_like(s_ref)
        q_ref[...] = jnp.zeros_like(q_ref)

    a1 = jnp.maximum(x1_ref[...], 0)
    a2 = jnp.maximum(x2_ref[...], 0)
    y1 = jnp.dot(a1, w1_ref[...], preferred_element_type=jnp.float32)
    y2 = jnp.dot(a2, w2_ref[...], preferred_element_type=jnp.float32)
    s_ref[:, :c_half_p] += jnp.sum(y1, axis=0, keepdims=True)
    s_ref[:, c_half_p:] += jnp.sum(y2, axis=0, keepdims=True)
    q_ref[:, :c_half_p] += jnp.sum(y1 * y1, axis=0, keepdims=True)
    q_ref[:, c_half_p:] += jnp.sum(y2 * y2, axis=0, keepdims=True)


# ---------------------------------------------------------------------------
# Pass 2: recompute the cheap matmuls fused with the BN affine and write the
# final output directly (single HBM write of the large tensor).
# ---------------------------------------------------------------------------
def _fr_out_fused_kernel(xp_ref, wbd_ref, scale_ref, shift_ref, o_ref):
    a = jnp.maximum(xp_ref[...], 0)
    y = jnp.dot(a, wbd_ref[...], preferred_element_type=jnp.float32)
    o_ref[...] = (y * scale_ref[...] + shift_ref[...]).astype(o_ref.dtype)


def _fr_out_split_kernel(x1_ref, x2_ref, w1_ref, w2_ref, scale_ref, shift_ref,
                         o_ref, *, c_half_p):
    a1 = jnp.maximum(x1_ref[...], 0)
    a2 = jnp.maximum(x2_ref[...], 0)
    y1 = jnp.dot(a1, w1_ref[...], preferred_element_type=jnp.float32)
    y2 = jnp.dot(a2, w2_ref[...], preferred_element_type=jnp.float32)
    o_ref[:, :c_half_p] = (y1 * scale_ref[:, :c_half_p]
                           + shift_ref[:, :c_half_p]).astype(o_ref.dtype)
    o_ref[:, c_half_p:] = (y2 * scale_ref[:, c_half_p:]
                           + shift_ref[:, c_half_p:]).astype(o_ref.dtype)


def factorized_reduce(x_nchw, w1, w2, gamma, beta, *,
                      tile_m=None,
                      matmul_dtype=jnp.bfloat16,
                      fuse=None,
                      vmem_limit_bytes=None):
    """x_nchw: (N, C_in, H, W).  w1, w2: (C_in, C_out//2).  gamma/beta: (C_out,)."""
    N, C_in, H, W = x_nchw.shape
    assert H % 2 == 0 and W % 2 == 0, "FactorizedReduce expects even H and W"
    C_half = w1.shape[1]
    C_out = 2 * C_half

    # Lane-dense channel padding (all stores are unmasked full-lane vst).
    C_half_p = _round_up(C_half, LANE)
    C_out_p = 2 * C_half_p

    # Block-diagonal fusion fills the 256-wide v6e/v7x MXU output when each
    # half only spans 128 lanes; skip it when the doubled K would waste pushes.
    if fuse is None:
        fuse = (2 * C_in <= 256) and (C_half_p == LANE)

    # Generation-aware VMEM budget (v5e/v6e: 128 MiB physical, v7x: 64 MiB).
    phys_vmem = _tpu_vmem_capacity_bytes()
    if phys_vmem >= 100 * (1 << 20):
        default_limit, tile_cap = 64 * (1 << 20), 2048
    else:
        default_limit, tile_cap = 32 * (1 << 20), 1024
    if vmem_limit_bytes is None:
        vmem_limit_bytes = default_limit

    # Stride-2 1x1 conv == strided spatial subsample + channel matmul.
    # (relayout stays in XLA, see TODO at top; activations pre-cast to the
    # matmul dtype so both passes read half the bytes in bf16 mode.)
    Ho, Wo = H // 2, W // 2
    M = N * Ho * Wo
    in_dt = matmul_dtype
    x1 = jnp.transpose(x_nchw[:, :, ::2, ::2],
                       (0, 2, 3, 1)).reshape(M, C_in).astype(in_dt)
    x2 = jnp.transpose(x_nchw[:, :, 1::2, 1::2],
                       (0, 2, 3, 1)).reshape(M, C_in).astype(in_dt)

    # Weights: pad + cast once in the wrapper (no per-grid-step cast).
    w1p = jnp.pad(w1, ((0, 0), (0, C_half_p - C_half))).astype(in_dt)
    w2p = jnp.pad(w2, ((0, 0), (0, C_half_p - C_half))).astype(in_dt)
    if fuse:
        zero = jnp.zeros_like(w1p)
        wbd = jnp.concatenate(
            [jnp.concatenate([w1p, zero], axis=1),
             jnp.concatenate([zero, w2p], axis=1)], axis=0)   # (2*C_in, C_out_p)
        xp = jnp.concatenate([x1, x2], axis=-1)               # (M, 2*C_in)

    # ----------------- tile size: account for everything in VMEM -----------
    in_b = jnp.dtype(in_dt).itemsize
    acc_b = 4
    k_dim = 2 * C_in
    if tile_m is None:
        per_row = (2 * k_dim * in_b          # double-buffered activation tile(s)
                   + k_dim * in_b            # relu'd temporary
                   + C_out_p * acc_b         # f32 y temporary
                   + 2 * C_out_p * acc_b)    # double-buffered output tile (pass 2)
        fixed = (2 * k_dim * C_out_p * in_b  # weights (double-buffer worst case)
                 + 16 * C_out_p * acc_b      # stats accumulators, scale/shift
                 + (2 << 20))                # headroom for Mosaic scratch
        tile_m = max(8, (vmem_limit_bytes - fixed) // per_row)
        tile_m = min(tile_cap, tile_m // 8 * 8)
    tile_m = int(max(8, min(tile_m, _round_up(M, 8))))

    n_tiles = (M + tile_m - 1) // tile_m
    # Leading "parallel" axis of size 2 lets both v7x TensorCores run pass 1.
    n_split = 2 if n_tiles >= 2 else 1
    if n_tiles % n_split:
        n_tiles += 1
    tiles_per_split = n_tiles // n_split
    M_pad = n_tiles * tile_m
    if M_pad != M:
        # Zero rows contribute exactly 0 to sum / sumsq (relu(0) @ w == 0),
        # so dividing by the true M below gives exact batch statistics.
        if fuse:
            xp = jnp.pad(xp, ((0, M_pad - M), (0, 0)))
        else:
            x1 = jnp.pad(x1, ((0, M_pad - M), (0, 0)))
            x2 = jnp.pad(x2, ((0, M_pad - M), (0, 0)))

    # ----------------- pass 1: per-channel sum / sum-of-squares ------------
    if fuse:
        kernel1 = _fr_stats_fused_kernel
        inputs1 = (xp, wbd)
        in_specs1 = [
            pl.BlockSpec((tile_m, k_dim),
                         lambda c, i: (c * tiles_per_split + i, 0)),
            pl.BlockSpec((k_dim, C_out_p), lambda c, i: (0, 0)),
        ]
    else:
        kernel1 = functools.partial(_fr_stats_split_kernel, c_half_p=C_half_p)
        inputs1 = (x1, x2, w1p, w2p)
        in_specs1 = [
            pl.BlockSpec((tile_m, C_in),
                         lambda c, i: (c * tiles_per_split + i, 0)),
            pl.BlockSpec((tile_m, C_in),
                         lambda c, i: (c * tiles_per_split + i, 0)),
            pl.BlockSpec((C_in, C_half_p), lambda c, i: (0, 0)),
            pl.BlockSpec((C_in, C_half_p), lambda c, i: (0, 0)),
        ]

    flops1 = 2 * M_pad * (k_dim if fuse else C_in) * C_out_p + 3 * M_pad * C_out_p
    bytes1 = in_b * (M_pad * k_dim + k_dim * C_out_p) + 8 * n_split * C_out_p

    s, q = pl.pallas_call(
        kernel1,
        out_shape=(
            jax.ShapeDtypeStruct((1, n_split * C_out_p), jnp.float32),
            jax.ShapeDtypeStruct((1, n_split * C_out_p), jnp.float32),
        ),
        grid=(n_split, tiles_per_split),
        in_specs=in_specs1,
        out_specs=(
            pl.BlockSpec((1, C_out_p), lambda c, i: (0, c)),   # per-core lane block
            pl.BlockSpec((1, C_out_p), lambda c, i: (0, c)),
        ),
        compiler_params=pltpu.CompilerParams(
            dimension_semantics=("parallel", "arbitrary"),
            vmem_limit_bytes=vmem_limit_bytes),
        cost_estimate=pl.CostEstimate(
            flops=int(flops1), transcendentals=0, bytes_accessed=int(bytes1)),
    )(*inputs1)

    # ----------------- tiny BN finalize (per-channel) in the wrapper -------
    inv_m = 1.0 / float(M)
    s_tot = jnp.sum(s.reshape(n_split, C_out_p), axis=0)
    q_tot = jnp.sum(q.reshape(n_split, C_out_p), axis=0)
    mean = s_tot * inv_m
    # NOTE: E[y^2]-E[y]^2 in f32 can lose bits when |mean| >> std and M is
    # huge; clamped at 0 and acceptable at BN tolerances.
    var = jnp.maximum(q_tot * inv_m - mean * mean, 0.0)

    def _pad_c(v):
        return jnp.pad(v, (0, C_half_p - C_half))

    gamma_p = jnp.concatenate([_pad_c(gamma[:C_half]), _pad_c(gamma[C_half:])])
    beta_p = jnp.concatenate([_pad_c(beta[:C_half]), _pad_c(beta[C_half:])])
    rstd = jax.lax.rsqrt(var + EPS)
    scale = (gamma_p * rstd).reshape(1, C_out_p).astype(jnp.float32)
    shift = (beta_p - mean * gamma_p * rstd).reshape(1, C_out_p).astype(jnp.float32)

    # ----------------- pass 2: recompute + normalize, write final output ---
    out_dtype = x_nchw.dtype
    if fuse:
        kernel2 = _fr_out_fused_kernel
        inputs2 = (xp, wbd, scale, shift)
        in_specs2 = [
            pl.BlockSpec((tile_m, k_dim), lambda i: (i, 0)),
            pl.BlockSpec((k_dim, C_out_p), lambda i: (0, 0)),
            pl.BlockSpec((1, C_out_p), lambda i: (0, 0)),
            pl.BlockSpec((1, C_out_p), lambda i: (0, 0)),
        ]
    else:
        kernel2 = functools.partial(_fr_out_split_kernel, c_half_p=C_half_p)
        inputs2 = (x1, x2, w1p, w2p, scale, shift)
        in_specs2 = [
            pl.BlockSpec((tile_m, C_in), lambda i: (i, 0)),
            pl.BlockSpec((tile_m, C_in), lambda i: (i, 0)),
            pl.BlockSpec((C_in, C_half_p), lambda i: (0, 0)),
            pl.BlockSpec((C_in, C_half_p), lambda i: (0, 0)),
            pl.BlockSpec((1, C_out_p), lambda i: (0, 0)),
            pl.BlockSpec((1, C_out_p), lambda i: (0, 0)),
        ]

    flops2 = 2 * M_pad * (k_dim if fuse else C_in) * C_out_p + 2 * M_pad * C_out_p
    bytes2 = (in_b * (M_pad * k_dim + k_dim * C_out_p)
              + jnp.dtype(out_dtype).itemsize * M_pad * C_out_p)

    out_flat = pl.pallas_call(
        kernel2,
        out_shape=jax.ShapeDtypeStruct((M_pad, C_out_p), out_dtype),
        grid=(n_tiles,),
        in_specs=in_specs2,
        out_specs=pl.BlockSpec((tile_m, C_out_p), lambda i: (i, 0)),
        compiler_params=pltpu.CompilerParams(
            dimension_semantics=("parallel",),
            vmem_limit_bytes=vmem_limit_bytes),
        cost_estimate=pl.CostEstimate(
            flops=int(flops2), transcendentals=0, bytes_accessed=int(bytes2)),
    )(*inputs2)

    # Strip padded rows / channels and return NCHW (no copies when C_half is
    # already a multiple of 128 and M needed no padding).
    if C_half_p == C_half:
        out_nhwc = (out_flat if M_pad == M else out_flat[:M]).reshape(
            N, Ho, Wo, C_out)
    else:
        out_nhwc = jnp.concatenate(
            [out_flat[:M, :C_half],
             out_flat[:M, C_half_p:C_half_p + C_half]], axis=-1
        ).reshape(N, Ho, Wo, C_out)
    return jnp.transpose(out_nhwc, (0, 3, 1, 2))


def _reference(x, w1, w2, gamma, beta):
    """Pure-JAX reference for sanity checking."""
    xr = jnp.maximum(x, 0.0)
    x1 = jnp.transpose(xr[:, :, ::2, ::2], (0, 2, 3, 1))
    x2 = jnp.transpose(xr[:, :, 1::2, 1::2], (0, 2, 3, 1))
    y1 = jnp.einsum('nhwc,ck->nhwk', x1, w1)
    y2 = jnp.einsum('nhwc,ck->nhwk', x2, w2)
    y = jnp.concatenate([y1, y2], axis=-1)            # NHWC
    mean = jnp.mean(y, axis=(0, 1, 2), keepdims=True)
    var = jnp.mean((y - mean) ** 2, axis=(0, 1, 2), keepdims=True)
    y = (y - mean) * jax.lax.rsqrt(var + EPS) * gamma + beta
    return jnp.transpose(y, (0, 3, 1, 2))


if __name__ == "__main__":
    key = jax.random.PRNGKey(0)
    N, C_in, H, W = 2, 4, 16, 16
    C_out = 8
    C_half = C_out // 2

    k_x, k_w1, k_w2 = jax.random.split(key, 3)
    x = jax.random.normal(k_x, (N, C_in, H, W), dtype=jnp.float32)

    # kaiming_normal_ (fan_in mode, gain=sqrt(2)), fan_in = C_in*1*1.
    std = (2.0 / C_in) ** 0.5
    # torch conv weight is (C_half, C_in, 1, 1); we store its transpose
    # (C_in, C_half) so the kernels compute y = x @ w.
    w1 = (std * jax.random.normal(k_w1, (C_half, C_in), dtype=jnp.float32)).T
    w2 = (std * jax.random.normal(k_w2, (C_half, C_in), dtype=jnp.float32)).T

    # BatchNorm affine params per module init: weight=1, bias=0.
    gamma = jnp.ones((C_out,), dtype=jnp.float32)
    beta = jnp.zeros((C_out,), dtype=jnp.float32)

    ref = _reference(x, w1, w2, gamma, beta)

    # (1) f32 matmuls, fused block-diagonal path, 4 tiles + 2-way core split.
    out = jax.block_until_ready(
        factorized_reduce(x, w1, w2, gamma, beta,
                          tile_m=32, matmul_dtype=jnp.float32))
    assert out.shape == (N, C_out, H // 2, W // 2)
    assert jnp.allclose(out, ref, atol=1e-4, rtol=1e-4)

    # (2) f32 matmuls, forced split (two-matmul) path.
    out_split = jax.block_until_ready(
        factorized_reduce(x, w1, w2, gamma, beta,
                          tile_m=32, matmul_dtype=jnp.float32, fuse=False))
    assert jnp.allclose(out_split, ref, atol=1e-4, rtol=1e-4)

    # (3) defaults: bf16 MXU path + auto (generation-aware) tile sizing.
    out_bf16 = jax.block_until_ready(factorized_reduce(x, w1, w2, gamma, beta))
    assert jnp.allclose(out_bf16, ref, atol=5e-2, rtol=5e-2)

    print("KERNEL_OK")
</pallas_src>

<mosaic_0001>
module attributes {stable_mosaic.version = 11 : i64} {
  func.func @_fr_stats_fused_kernel(%arg0: i32, %arg1: i32, %arg2: memref<32x8xf32, #tpu.memory_space<vmem>>, %arg3: memref<8x256xf32, #tpu.memory_space<vmem>>, %arg4: memref<1x256xf32, #tpu.memory_space<vmem>>, %arg5: memref<1x256xf32, #tpu.memory_space<vmem>>) attributes {dimension_semantics = [#tpu.dimension_semantics<parallel>, #tpu.dimension_semantics<arbitrary>], iteration_bounds = array<i64: 2, 2>, scalar_prefetch = 0 : i64, scratch_operands = 0 : i64, tpu.core_type = #tpu.core_type<tc>, window_params = [{transform_indices = @transform_0, window_bounds = array<i64: 32, 8>}, {pipeline_mode = #tpu.pipeline_mode<synchronous>, transform_indices = @transform_1, window_bounds = array<i64: 8, 256>}, {transform_indices = @transform_2, window_bounds = array<i64: 1, 256>}, {transform_indices = @transform_3, window_bounds = array<i64: 1, 256>}]} {
    %c0_i32 = arith.constant 0 : i32
    %0 = arith.cmpi eq, %arg1, %c0_i32 : i32
    %1 = arith.extui %0 : i1 to i32
    %c0_i32_0 = arith.constant 0 : i32
    %2 = arith.cmpi ne, %1, %c0_i32_0 : i32
    scf.if %2 {
      %cst_15 = arith.constant 0.000000e+00 : f32
      %19 = vector.broadcast %cst_15 : f32 to vector<1x256xf32>
      %c0_16 = arith.constant 0 : index
      %c0_17 = arith.constant 0 : index
      %20 = vector.load %arg4[%c0_16, %c0_17] : memref<1x256xf32, #tpu.memory_space<vmem>>, vector<1x256xf32>
      tpu.vector_store %arg4[%c0_16, %c0_17], %19 {strides = array<i32>} : memref<1x256xf32, #tpu.memory_space<vmem>>, vector<1x256xf32>,
      %cst_18 = arith.constant 0.000000e+00 : f32
      %21 = vector.broadcast %cst_18 : f32 to vector<1x256xf32>
      %c0_19 = arith.constant 0 : index
      %c0_20 = arith.constant 0 : index
      %22 = vector.load %arg5[%c0_19, %c0_20] : memref<1x256xf32, #tpu.memory_space<vmem>>, vector<1x256xf32>
      tpu.vector_store %arg5[%c0_19, %c0_20], %21 {strides = array<i32>} : memref<1x256xf32, #tpu.memory_space<vmem>>, vector<1x256xf32>,
    } else {
    }
    %c0 = arith.constant 0 : index
    %c0_1 = arith.constant 0 : index
    %3 = vector.load %arg2[%c0, %c0_1] : memref<32x8xf32, #tpu.memory_space<vmem>>, vector<32x8xf32>
    %cst = arith.constant 0.000000e+00 : f32
    %4 = vector.broadcast %cst : f32 to vector<32x8xf32>
    %5 = arith.maximumf %3, %4 : vector<32x8xf32>
    %c0_2 = arith.constant 0 : index
    %c0_3 = arith.constant 0 : index
    %6 = vector.load %arg3[%c0_2, %c0_3] : memref<8x256xf32, #tpu.memory_space<vmem>>, vector<8x256xf32>
    %cst_4 = arith.constant dense<0.000000e+00> : vector<32x256xf32>
    %7 = tpu.matmul %5, %6, %cst_4 {dimension_numbers = #tpu.dot_dimension_numbers<[1], [0], [0], [1], [0, 0, 1, 1], [], []>} : vector<32x8xf32>, vector<8x256xf32>, vector<32x256xf32> -> vector<32x256xf32>
    %c0_5 = arith.constant 0 : index
    %c0_6 = arith.constant 0 : index
    %8 = vector.load %arg4[%c0_5, %c0_6] : memref<1x256xf32, #tpu.memory_space<vmem>>, vector<1x256xf32>
    %cst_7 = arith.constant dense<0.000000e+00> : vector<256xf32>
    %9 = vector.multi_reduction <add>, %7, %cst_7 [0] : vector<32x256xf32> to vector<256xf32>
    %10 = vector.shape_cast %9 : vector<256xf32> to vector<1x256xf32>
    %11 = arith.addf %8, %10 : vector<1x256xf32>
    %c0_8 = arith.constant 0 : index
    %c0_9 = arith.constant 0 : index
    %12 = vector.load %arg4[%c0_8, %c0_9] : memref<1x256xf32, #tpu.memory_space<vmem>>, vector<1x256xf32>
    tpu.vector_store %arg4[%c0_8, %c0_9], %11 {strides = array<i32>} : memref<1x256xf32, #tpu.memory_space<vmem>>, vector<1x256xf32>,
    %c0_10 = arith.constant 0 : index
    %c0_11 = arith.constant 0 : index
    %13 = vector.load %arg5[%c0_10, %c0_11] : memref<1x256xf32, #tpu.memory_space<vmem>>, vector<1x256xf32>
    %14 = arith.mulf %7, %7 : vector<32x256xf32>
    %cst_12 = arith.constant dense<0.000000e+00> : vector<256xf32>
    %15 = vector.multi_reduction <add>, %14, %cst_12 [0] : vector<32x256xf32> to vector<256xf32>
    %16 = vector.shape_cast %15 : vector<256xf32> to vector<1x256xf32>
    %17 = arith.addf %13, %16 : vector<1x256xf32>
    %c0_13 = arith.constant 0 : index
    %c0_14 = arith.constant 0 : index
    %18 = vector.load %arg5[%c0_13, %c0_14] : memref<1x256xf32, #tpu.memory_space<vmem>>, vector<1x256xf32>
    tpu.vector_store %arg5[%c0_13, %c0_14], %17 {strides = array<i32>} : memref<1x256xf32, #tpu.memory_space<vmem>>, vector<1x256xf32>,
    return
  }
  func.func @transform_0(%arg0: i32, %arg1: i32) -> (i32, i32) {
    %c2_i32 = arith.constant 2 : i32
    %0 = arith.muli %arg0, %c2_i32 : i32
    %1 = arith.addi %0, %arg1 : i32
    %c0_i32 = arith.constant 0 : i32
    %c0_i32_0 = arith.constant 0 : i32
    return %1, %c0_i32 : i32, i32
  }
  func.func @transform_1(%arg0: i32, %arg1: i32) -> (i32, i32) {
    %c0_i32 = arith.constant 0 : i32
    %c0_i32_0 = arith.constant 0 : i32
    %c0_i32_1 = arith.constant 0 : i32
    return %c0_i32, %c0_i32_0 : i32, i32
  }
  func.func @transform_2(%arg0: i32, %arg1: i32) -> (i32, i32) {
    %c0_i32 = arith.constant 0 : i32
    %c0_i32_0 = arith.constant 0 : i32
    return %c0_i32, %arg0 : i32, i32
  }
  func.func @transform_3(%arg0: i32, %arg1: i32) -> (i32, i32) {
    %c0_i32 = arith.constant 0 : i32
    %c0_i32_0 = arith.constant 0 : i32
    return %c0_i32, %arg0 : i32, i32
  }
}

</mosaic_0001>

<bundles_post_ra>
// kernel: tpu_custom_call.1
= control target key start
LH: loop header
LB: loop body
LE: loop exit
PB: predicated region body
PF: predicated region fallthrough
CT: control target
= control target key end

     0   :  { %9 = vsyncpa [#allocation3], 0  ;;  %s1015_s0 = inlined_call_operand.vmem [shape: f32[128,8], index: 0, kind: input, shape index: {}]   ;;  %s1016_s1 = inlined_call_operand.vmem [shape: f32[8,256], index: 1, kind: input, shape index: {}]   ;;  %s1017_s2 = inlined_call_operand.hbm [shape: f32[1,512], index: 2, kind: output, shape index: {0}]   ;;  %s1018_s3 = inlined_call_operand.hbm [shape: f32[1,512], index: 3, kind: output, shape index: {1}]  }
   0x1   :  { %11 = vsyncpa [#allocation3 + $0x1], 0 }
   0x2   :  { %12 = vsyncpa [#allocation5], 0 }
   0x3   :  { %14 = vsyncpa [#allocation5 + $0x1], 0  ;;  %s819_s12 = smov 0   ;;  %s821_s13 = smov 0  }
   0x4   :  { %s823_s14 = smov 0   ;;  %s825_s15 = smov 0  }
   0x5   :  { %s827_s16 = smov 0   ;;  %s829_s17 = smov 0  }
   0x6   :  { %s831_s18 = smov 0   ;;  %s833_s19 = smov 0  }
   0x7 LB: > { %s558_s20 = sadd.s32 4294967295, %s792_s19   ;;  %s559_s21 = sadd.s32 4294967294, %s792_s19   ;;  %s792_s19 = sphi %s833_s19, %s20_s19   ;;  %s788_s18 = sphi %s831_s18, %s1029_s18   ;;  %s784_s17 = sphi %s829_s17, %s1028_s17   ;;  %s780_s16 = sphi %s827_s16, %s1027_s16   ;;  %s776_s15 = sphi %s825_s15, %s1026_s15   ;;  %s772_s14 = sphi %s823_s14, %s1025_s14   ;;  %s768_s13 = sphi %s821_s13, %s1024_s13   ;;  %s764_s12 = sphi %s819_s12, %s1023_s12  }
   0x8   : > { %s29_s22 = sadd.s32 1, %s784_s17  ;;  %s32_s23 = sadd.s32 1, %s788_s18 }
   0x9   : > { %p30_p0 = scmp.ge.s32.totalorder %s29_s22, 2  ;;  %p100_p1 = scmp.ne.s32.totalorder %s772_s14, %s768_s13 }
   0xa   : > { %p101_p2 = scmp.eq.s32.totalorder %s558_s20, 3  ;;  %p106_p4 = scmp.ne.s32.totalorder %s768_s13, %s764_s12 }
   0xb   : > { %s1031_s22 = smov (%p30_p0, %s29_s22), 0  ;;  %s1033_s23 = smov (!%p30_p0, %s32_s23), %s788_s18 }
   0xc   : > { %p868_p3 = por %p101_p2, %p100_p1  ;;  %p34_p5 = scmp.ge.s32.totalorder %s1033_s23, 2 }
   0xd   : > { %p107_p6 = scmp.eq.s32.totalorder %s559_s21, 3  ;;  %p564_p7 = scmp.ge.s32.totalorder %s792_s19, 1 }
   0xe   : > { %p167_p8 = scmp.lt.s32.totalorder %s792_s19, 5  ;;  %s1035_s23 = smov (%p34_p5, %s1033_s23), 0 }
   0xf   : > { %p878_p9 = por %p107_p6, %p106_p4  ;;  %s87_s26 = ssub.s32 %s788_s18, %s1035_s23 }
  0x10   : > { %p168_p10 = pnand %p564_p7, %p167_p8  ;;  %s90_s27 = sadd.s32 1, %s772_s14 }
  0x11   : > { %p88_p11 = scmp.eq.s32.totalorder %s87_s26, 0  ;;  %s889_s29 = sand.u32 (!%p168_p10), 1, %s768_s13  }
  0x12   : > { %171 = sbr.rel (%p168_p10) target bundleno = 316 (0x13c), region = 28  ;;  %s567_s30 = sshll.u32 (!%p168_p10), %s780_s16, 1 }
  0x13   : > { %s886_s28 = scalar_select %p88_p11, %s772_s14, %s90_s27  }
  0x14   : > { %s565_s4 = sshll.u32 (!%p168_p10), %s889_s29, 1  ;;  %s199_s5 = sadd.s32 (!%p168_p10), %s776_s15, %s567_s30 }
  0x15   : > { %s568_s6 = sshll.u32 (!%p168_p10), %s199_s5, 2  ;;  %s897_s11 = scalar_lea.vmem (!%p168_p10), [#allocation2], %s565_s4 }
  0x16   : > { %p201_p12 = scmp.lt.s32.totalorder (!%p168_p10), %s568_s6, 15  ;;  %s899_s20 = scalar_lea.vmem (!%p168_p10), [#allocation4], %s565_s4 }
  0x17   : > { %p570_p13 = scmp.ne.s32.totalorder (!%p168_p10), %s776_s15, 0 }
  0x19   : > { %s1037_s6 = smov (!%p201_p12, %s568_s6), 15  ;;  %213 = sbr.rel (%p570_p13) target bundleno = 32 (0x20), region = 32 }
  0x1a   : > { %s569_s7 = sshll.u32 %s1037_s6, 3  ;;  %v214_v0 = vlaneseq (!%p570_p13)  ;;  %v794_v1 = vmov (!%p570_p13), 0.0  }
  0x1b   : > { %s204_s10 = scalar_lea.vmem %s1015_s0, %s569_s7 }
  0x1c   : > { %vm216_vm0 = vcmp.lt.s32.totalorder (!%p570_p13), %v214_v0, 256 }
  0x1d   : > { %218 = vst.msk [vmem:[%s897_s11] sm:$0x3] (!%p570_p13), %vm216_vm0, %v794_v1  ;;  %219 = vst.msk [vmem:[%s899_s20] sm:$0x3] (!%p570_p13), %vm216_vm0, %v794_v1 }
  0x20 PF: > { %v229_v2 = vld [vmem:[%s1016_s1 + $0x8] sm:$0xff]  ;;  %v228_v3 = vld [vmem:[%s1016_s1] sm:$0xff]  ;;  %vm230_vm1 = vcmask 64512   ;;  %v795_v5 = vmov 0.0   ;;  %v222_v7 = vld [vmem:[%s204_s10 + $0x10] sm:$0xff]  ;;  %v357_v49 = vlaneseq  ;;  %s583_s15 = sshll.u32 %s780_s16, 5 }
  0x21   : > { %v220_v4 = vld [vmem:[%s204_s10] sm:$0xff]  ;;  %243 = vmatprep.subr.mxu0 %v229_v2  ;;  %307 = vmatprep.mubr.f32.mxu0 %v795_v5  ;;  %v221_v8 = vld [vmem:[%s204_s10 + $0x8] sm:$0xff]  ;;  %v226_v9 = vmax.f32 %v222_v7, 0.0  ;;  %v223_v10 = vld [vmem:[%s204_s10 + $0x18] sm:$0xff]  ;;  %v796_v47 = vmov 1966171168   ;;  %s926_s8 = scalar_lea.hbm %s1017_s2, %s583_s15  ;;  %s936_s10 = scalar_lea.hbm %s1018_s3, %s583_s15 }
  0x22   : > { %v224_v6 = vmax.f32 %v220_v4, 0.0  ;;  %244 = vmatpush1.msra.mxu0 %v228_v3  ;;  %585 = vmatprep.subr.mxu1 %v229_v2  ;;  %v225_v11 = vmax.f32 %v221_v8, 0.0  ;;  %v227_v12 = vmax.f32 %v223_v10, 0.0  ;;  %v355_v48 = vunpack.c.l.s4 %v796_v47  ;;  %s442_s4 = sshll.u32 %s897_s11, 4  ;;  %s456_s5 = sshll.u32 %s899_s20, 4  ;;  %s928_s4 = int_to_ptr.vmem [resolvable:$true] %s442_s4  ;;  %s938_s5 = int_to_ptr.vmem [resolvable:$true] %s456_s5 }
  0x23   : > { %586 = vmatpush1.msra.mxu1 %v228_v3  ;;  %319 = vmatprep.mubr.f32.mxu1 %v795_v5  ;;  %v358_v59 = vshrl.u32 %v357_v49, 7  ;;  %vm917_vm2 = vcmp.lt.s32.totalorder %v357_v49, 256  ;;  %s423_s21 = scalar_lea.sflag [#allocation3], %s889_s29  ;;  %s666_s26 = scalar_lea.vmem %s928_s4, 32 }
  0x24   : > { %571 = vmatmul.mubr.msk.f32.vlgmr.msra.gmra.mrb[0].mxu0 %vm230_vm1, %v224_v6  ;;  %573 = vmatmul.mubr.msk.f32.vlgmr.msra.gmra.mrb[0].mxu1 %vm230_vm1, %v226_v9  ;;  %v356_v58 = vunpack.c.0.s8 %v355_v48  ;;  %v332_v10 = vld [vmem:[%s897_s11] sm:$0x3]  ;;  %p667_p0 = scmp.ne.s32.totalorder %s928_s4, %s666_s26  ;;  %s797_s27 = smov [#allocation2]  }
  0x25   : > { %313 = vmatprep.mubr.f32.mxu0 %v795_v5  ;;  %325 = vmatprep.mubr.f32.mxu1 %v795_v5  ;;  %s670_s30 = sshll.u32 %s797_s27, 4  ;;  %s671_s30 = int_to_ptr.vmem [resolvable:$false] %s670_s30 }
  0x26   : > { %v359_v4 = vsub.s32 %v356_v58, %v358_v59  ;;  %p668_p1 = pnand %p667_p0, %p868_p3  ;;  %s672_s6 = scalar_lea.vmem %s671_s30, 64 }
  0x27   : > { %p673_p4 = scmp.lt.s32.totalorder %s928_s4, %s671_s30  ;;  %p674_p5 = scmp.lt.s32.totalorder %s672_s6, %s666_s26 }
  0x28   : > { %572 = vmatmul.mubr.msk.f32.gmra.mrb[2].mxu0 %vm230_vm1, %v225_v11  ;;  %574 = vmatmul.mubr.msk.f32.gmra.mrb[2].mxu1 %vm230_vm1, %v227_v12  ;;  %p669_p2 = pneg %p668_p1 }
  0x29   : > { %p675_p6 = por %p674_p5, %p673_p4 }
  0x2b   : > { %p676_p7 = pnand %p675_p6, %p669_p2 }
  0xf7   : > { %v309_v13 = vpop.f32.mrb[0].mxu0  ;;  %v321_v15 = vpop.f32.mrb[0].mxu1 }
  0xf8   : > { %v311_v14 = vpop.f32.mrb[1].mxu0  ;;  %v323_v16 = vpop.f32.mrb[1].mxu1  ;;  %v376_v18 = vmul.f32 %v309_v13, %v309_v13  ;;  %v380_v26 = vmul.f32 %v321_v15, %v321_v15 }
  0xf9   : > { %v377_v22 = vmul.f32 %v311_v14, %v311_v14  ;;  %v381_v31 = vmul.f32 %v323_v16, %v323_v16 }
  0xfb   : > { %v315_v17 = vpop.f32.mrb[2].mxu0  ;;  %v327_v25 = vpop.f32.mrb[2].mxu1 }
  0xfc   : > { %v333_v19 = vadd.f32 %v315_v17, %v309_v13  ;;  %v378_v20 = vmul.f32 %v315_v17, %v315_v17  ;;  %v317_v21 = vpop.f32.mrb[3].mxu0  ;;  %v382_v29 = vmul.f32 %v327_v25, %v327_v25  ;;  %v329_v30 = vpop.f32.mrb[3].mxu1 }
  0xfd   : > { %v342_v23 = vadd.f32 %v317_v21, %v311_v14  ;;  %v379_v24 = vmul.f32 %v317_v21, %v317_v21  ;;  %v383_v34 = vmul.f32 %v329_v30, %v329_v30  ;;  %v375_v14 = vld [vmem:[%s899_s20] sm:$0x3] }
  0xfe   : > { %v384_v27 = vadd.f32 %v378_v20, %v376_v18  ;;  %v334_v28 = vadd.f32 %v333_v19, %v321_v15 }
  0xff   : > { %v393_v32 = vadd.f32 %v379_v24, %v377_v22  ;;  %v343_v33 = vadd.f32 %v342_v23, %v323_v16 }
 0x100   : > { %v335_v35 = vadd.f32 %v334_v28, %v327_v25  ;;  %v385_v36 = vadd.f32 %v384_v27, %v380_v26 }
 0x101   : > { %v344_v37 = vadd.f32 %v343_v33, %v329_v30  ;;  %v394_v38 = vadd.f32 %v393_v32, %v381_v31 }
 0x102   : > { %v336_v39 = vrot.slane %v335_v35, 4  ;;  %v386_v40 = vadd.f32 %v385_v36, %v382_v29 }
 0x103   : > { %v345_v41 = vrot.slane %v344_v37, 4  ;;  %v395_v42 = vadd.f32 %v394_v38, %v383_v34 }
 0x104   : > { %v337_v43 = vadd.f32 %v336_v39, %v335_v35  ;;  %v387_v44 = vrot.slane %v386_v40, 4 }
 0x105   : > { %v346_v45 = vadd.f32 %v345_v41, %v344_v37  ;;  %v396_v46 = vrot.slane %v395_v42, 4 }
 0x106   : > { %v338_v50 = vrot.slane %v337_v43, 2  ;;  %v388_v51 = vadd.f32 %v387_v44, %v386_v40 }
 0x107   : > { %v347_v52 = vrot.slane %v346_v45, 2  ;;  %v397_v53 = vadd.f32 %v396_v46, %v395_v42 }
 0x108   : > { %v339_v54 = vadd.f32 %v338_v50, %v337_v43  ;;  %v389_v55 = vrot.slane %v388_v51, 2 }
 0x109   : > { %v348_v56 = vadd.f32 %v347_v52, %v346_v45  ;;  %v398_v57 = vrot.slane %v397_v53, 2 }
 0x10a   : > { %v340_v60 = vrot.slane %v339_v54, 1  ;;  %v390_v61 = vadd.f32 %v389_v55, %v388_v51 }
 0x10b   : > { %v349_v62 = vrot.slane %v348_v56, 1  ;;  %v399_v63 = vadd.f32 %v398_v57, %v397_v53 }
 0x10c   : > { %v341_v0 = vadd.f32 %v340_v60, %v339_v54  ;;  %v391_v1 = vrot.slane %v390_v61, 1 }
 0x10d   : > { %v350_v2 = vadd.f32 %v349_v62, %v348_v56  ;;  %v400_v3 = vrot.slane %v399_v63, 1 }
 0x10e   : > { %v392_v5 = vadd.f32 %v391_v1, %v390_v61 }
 0x10f   : > { %v353_v6 = vcombine.low %v341_v0, %v350_v2  ;;  %v401_v7 = vadd.f32 %v400_v3, %v399_v63 }
 0x111   : > { %v404_v8 = vcombine.low %v392_v5, %v401_v7  ;;  %v360_v9 = vrot.slane %v353_v6, %v359_v4 }
 0x113   : > { %v367_v11 = vrot.slane %v360_v9, %v359_v4  ;;  %v411_v12 = vrot.slane %v404_v8, %v359_v4 }
 0x115   : > { %v369_v15 = vadd.f32 %v367_v11, %v332_v10  ;;  %v418_v16 = vrot.slane %v411_v12, %v359_v4 }
 0x117   : > { %374 = vst.msk [vmem:[%s897_s11] sm:$0x3] %vm917_vm2, %v369_v15  ;;  %v420_v17 = vadd.f32 %v418_v16, %v375_v14 }
 0x118   : > { %679 = shalt.err (!%p676_p7)
}
 0x119   : > { %s680_s11 = scalar_lea.hbm %s926_s8, 32  ;;  %s684_s16 = scalar_lea.hbm %s1017_s2, 64 }
 0x11a   : > { %p681_p8 = scmp.ne.s32.totalorder %s926_s8, %s680_s11  ;;  %p685_p12 = scmp.lt.u32.totalorder %s926_s8, %s1017_s2 }
 0x11b   : > { %p686_p13 = scmp.lt.u32.totalorder %s684_s16, %s680_s11  ;;  %p688_p1 = scmp.lt.u32.totalorder %s680_s11, %s926_s8 }
 0x11c   : > { %p682_p10 = pnand %p681_p8, %p868_p3 }
 0x11d   : > { %p687_p0 = por %p686_p13, %p685_p12 }
 0x11e   : > { %p683_p11 = pneg %p682_p10 }
 0x11f   : > { %p689_p2 = por %p688_p1, %p687_p0 }
 0x121   : > { %p690_p4 = pnand %p689_p2, %p683_p11 }
 0x123   : > { %693 = shalt.err (!%p690_p4)
}
 0x124   : > { %587 = dma.vmem_to_hbm [thread:$0]  (%p868_p3), %s928_s4, 32, %s926_s8, %s423_s21   ;;  %421 = vst.msk [vmem:[%s899_s20] sm:$0x3] %vm917_vm2, %v420_v17 }
 0x125   : > { %s428_s26 = scalar_lea.sflag [#allocation5], %s889_s29  ;;  %s694_s30 = scalar_lea.vmem %s938_s5, 32 }
 0x126   : > { %p695_p5 = scmp.ne.s32.totalorder %s938_s5, %s694_s30  ;;  %s798_s6 = smov [#allocation4]  }
 0x127   : > { %s698_s11 = sshll.u32 %s798_s6, 4  ;;  %s699_s11 = int_to_ptr.vmem [resolvable:$false] %s698_s11 }
 0x128   : > { %p696_p6 = pnand %p695_p5, %p868_p3  ;;  %s700_s15 = scalar_lea.vmem %s699_s11, 64 }
 0x129   : > { %p701_p8 = scmp.lt.s32.totalorder %s938_s5, %s699_s11  ;;  %p702_p10 = scmp.lt.s32.totalorder %s700_s15, %s694_s30 }
 0x12a   : > { %p697_p7 = pneg %p696_p6 }
 0x12b   : > { %p703_p11 = por %p702_p10, %p701_p8 }
 0x12d   : > { %p704_p12 = pnand %p703_p11, %p697_p7 }
 0x12f   : > { %707 = shalt.err (!%p704_p12)
}
 0x130   : > { %s708_s29 = scalar_lea.hbm %s936_s10, 32  ;;  %s712_s8 = scalar_lea.hbm %s1018_s3, 64 }
 0x131   : > { %p709_p13 = scmp.ne.s32.totalorder %s936_s10, %s708_s29  ;;  %p713_p2 = scmp.lt.u32.totalorder %s936_s10, %s1018_s3 }
 0x132   : > { %p714_p4 = scmp.lt.u32.totalorder %s712_s8, %s708_s29  ;;  %p716_p6 = scmp.lt.u32.totalorder %s708_s29, %s936_s10 }
 0x133   : > { %p710_p0 = pnand %p709_p13, %p868_p3 }
 0x134   : > { %p715_p5 = por %p714_p4, %p713_p2 }
 0x135   : > { %p711_p1 = pneg %p710_p0 }
 0x136   : > { %p717_p7 = por %p716_p6, %p715_p5 }
 0x138   : > { %p718_p8 = pnand %p717_p7, %p711_p1 }
 0x13a   : > { %721 = shalt.err (!%p718_p8)
}
 0x13b   : > { %588 = dma.vmem_to_hbm [thread:$0]  (%p868_p3), %s938_s5, 32, %s936_s10, %s428_s26  }
 0x13c PF: > { %p598_p10 = scmp.ge.s32.totalorder %s792_s19, 2  ;;  %s468_s16 = sand.u32 1, %s764_s12  }
 0x13d   : > { %s469_s9 = scalar_lea.sflag [#allocation3], %s468_s16 }
 0x13e   : > { %p592_p11 = pnand %p598_p10, %p878_p9 }
 0x140   : > { %755 = dma.done.wait (!%p592_p11), %s469_s9, 32  }
 0x141   : > { %757 = vsyncadd (!%p592_p11), %s469_s9, 4294967264  ;;  %s478_s27 = scalar_lea.sflag [#allocation5], %s468_s16 }
 0x142   : > { %759 = dma.done.wait (!%p592_p11), %s478_s27, 32  }
 0x143   : > { %761 = vsyncadd (!%p592_p11), %s478_s27, 4294967264  ;;  %s20_s19 = sadd.s32 1, %s792_s19   ;;  %s1023_s12 = smov %s768_s13 }
 0x144   : > { %p17_p12 = scmp.ge.s32.totalorder %s20_s19, 6   ;;  %s1024_s13 = smov %s772_s14 }
 0x145   : > { %s1025_s14 = smov %s886_s28  ;;  %s1026_s15 = smov %s784_s17 }
 0x146   : > { %s1027_s16 = smov %s788_s18  ;;  %s1028_s17 = smov %s1031_s22 }
 0x147   : > { %s1029_s18 = smov %s1035_s23  ;;  %19 = sbr.rel (!%p17_p12) target bundleno = 7 (0x7), region = 84 }
 0x14e   :  { %483 = vsyncpa [#allocation3], 1 }
 0x14f   :  { %485 = vsyncpa [#allocation3 + $0x1], 1 }
 0x150   :  { %486 = vsyncpa [#allocation5], 1 }
 0x151   :  { %488 = vsyncpa [#allocation5 + $0x1], 1 }

</bundles_post_ra>
